<compile_context>
chip_gen: v7x
topology: tpu7x:2x2x1
jax: 0.10.0
libtpu: 0.0.40
codegen_flags: <defaults>
</compile_context>

<pallas_src>
import jax
import jax.numpy as jnp
from jax.experimental import pallas as pl
from jax.experimental.pallas import tpu as pltpu

NUM_CLASSES = 10
HIDDEN = 512


def classifier1_kernel(x_ref, w1_ref, b1_ref, w2_ref, b2_ref, o_ref):
    # x_ref:  (TM, 512)     bf16 VMEM   (batch tile, moves with grid)
    # w1_ref: (512, 512)    bf16 VMEM   (resident across grid)
    # b1_ref: (1, 512)      f32  VMEM   (resident)
    # w2_ref: (512, C_pad)  bf16 VMEM   (resident)
    # b2_ref: (1, C_pad)    f32  VMEM   (resident)
    # o_ref:  (TM, C_pad)   f32  VMEM
    x = x_ref[...]
    h = jnp.dot(x, w1_ref[...], preferred_element_type=jnp.float32) + b1_ref[...]
    h = jnp.maximum(h, 0.0)                                   # ReLU after lin1
    p = jnp.dot(h.astype(jnp.bfloat16), w2_ref[...],
                preferred_element_type=jnp.float32) + b2_ref[...]
    o_ref[...] = jnp.maximum(p, 0.0).astype(o_ref.dtype)      # ReLU on preds


def classifier1_forward(x, w1, b1, w2, b2, *, tm=256):
    """x: (B, 512) f32. w1: (512,512), b1: (512,), w2: (512,C), b2: (C,)
    (weights pre-transposed to (in_features, out_features)).
    Returns (B, C) float32."""
    B, K = x.shape
    assert K == HIDDEN, f"expected {HIDDEN} input features, got {K}"
    C = w2.shape[1]

    # Lane-dense output: pad class dim up to a multiple of 128.
    C_pad = 128 * pl.cdiv(C, 128)
    # Batch tile: multiple of 8 (sublane aligned), capped at `tm`.
    TM = tm if B >= tm else 8 * pl.cdiv(max(B, 1), 8)
    B_pad = TM * pl.cdiv(B, TM)

    x_p = jnp.pad(x, ((0, B_pad - B), (0, 0))) if B_pad != B else x
    w2_p = jnp.pad(w2, ((0, 0), (0, C_pad - C))) if C_pad != C else w2
    b2_p = jnp.pad(b2, (0, C_pad - C)) if C_pad != C else b2

    # bf16 activations / weights (halve DMA bytes, 2x MXU); f32 biases/accum.
    x_bf = x_p.astype(jnp.bfloat16)
    w1_bf = w1.astype(jnp.bfloat16)
    w2_bf = w2_p.astype(jnp.bfloat16)
    b1_2d = b1.reshape(1, K).astype(jnp.float32)
    b2_2d = b2_p.reshape(1, C_pad).astype(jnp.float32)

    out_padded = pl.pallas_call(
        classifier1_kernel,
        out_shape=jax.ShapeDtypeStruct((B_pad, C_pad), jnp.float32),
        grid=(B_pad // TM,),
        in_specs=[
            pl.BlockSpec((TM, K), lambda i: (i, 0)),       # x tile moves
            pl.BlockSpec((K, K), lambda i: (0, 0)),        # w1 resident
            pl.BlockSpec((1, K), lambda i: (0, 0)),        # b1 resident
            pl.BlockSpec((K, C_pad), lambda i: (0, 0)),    # w2 resident
            pl.BlockSpec((1, C_pad), lambda i: (0, 0)),    # b2 resident
        ],
        out_specs=pl.BlockSpec((TM, C_pad), lambda i: (i, 0)),
        compiler_params=pltpu.CompilerParams(
            dimension_semantics=("parallel",)),            # megacore shard
    )(x_bf, w1_bf, b1_2d, w2_bf, b2_2d)

    return out_padded[:B, :C]


def init_params(key, num_classes=NUM_CLASSES):
    """Deterministic synthetic parameters matching PyTorch Linear shapes,
    pre-transposed to (in_features, out_features)."""
    k1, k2, k3, k4 = jax.random.split(key, 4)
    s = 1.0 / jnp.sqrt(512.0)  # PyTorch default init scale ~ 1/sqrt(fan_in)
    w1 = jax.random.uniform(k1, (HIDDEN, HIDDEN), jnp.float32, -s, s)
    b1 = jax.random.uniform(k2, (HIDDEN,), jnp.float32, -s, s)
    w2 = jax.random.uniform(k3, (HIDDEN, num_classes), jnp.float32, -s, s)
    b2 = jax.random.uniform(k4, (num_classes,), jnp.float32, -s, s)
    return w1, b1, w2, b2


def _reference_bf16(x, w1, b1, w2, b2):
    """Pure-JAX reference applying the same bf16 casts as the kernel."""
    h = jnp.dot(x.astype(jnp.bfloat16), w1.astype(jnp.bfloat16),
                preferred_element_type=jnp.float32) + b1
    h = jnp.maximum(h, 0.0)
    p = jnp.dot(h.astype(jnp.bfloat16), w2.astype(jnp.bfloat16),
                preferred_element_type=jnp.float32) + b2
    return jnp.maximum(p, 0.0)


if __name__ == "__main__":
    key = jax.random.PRNGKey(0)
    kx, kp, kx2 = jax.random.split(key, 3)

    w1, b1, w2, b2 = init_params(kp, NUM_CLASSES)

    # --- small batch: single grid step, batch/class padding exercised ---
    B = 8
    x = jax.random.normal(kx, (B, HIDDEN), dtype=jnp.float32)
    out = jax.block_until_ready(classifier1_forward(x, w1, b1, w2, b2))
    assert out.shape == (B, NUM_CLASSES)
    ref = _reference_bf16(x, w1, b1, w2, b2)
    assert jnp.allclose(out, ref, atol=1e-2, rtol=1e-2), "mismatch (B=8, bf16 ref)"
    ref_f32 = jnp.maximum(jnp.maximum(x @ w1 + b1, 0.0) @ w2 + b2, 0.0)
    assert jnp.allclose(out, ref_f32, atol=5e-2, rtol=5e-2), "mismatch (B=8, f32 ref)"

    # --- non-multiple batch: multi-step grid + batch padding exercised ---
    B2 = 20
    x2 = jax.random.normal(kx2, (B2, HIDDEN), dtype=jnp.float32)
    out2 = jax.block_until_ready(classifier1_forward(x2, w1, b1, w2, b2, tm=8))
    assert out2.shape == (B2, NUM_CLASSES)
    ref2 = _reference_bf16(x2, w1, b1, w2, b2)
    assert jnp.allclose(out2, ref2, atol=1e-2, rtol=1e-2), "mismatch (B=20, bf16 ref)"

    print("KERNEL_OK")
</pallas_src>

<mosaic_0001>
module attributes {stable_mosaic.version = 11 : i64} {
  func.func @classifier1_kernel(%arg0: i32, %arg1: memref<8x512xbf16, #tpu.memory_space<vmem>>, %arg2: memref<512x512xbf16, #tpu.memory_space<vmem>>, %arg3: memref<1x512xf32, #tpu.memory_space<vmem>>, %arg4: memref<512x128xbf16, #tpu.memory_space<vmem>>, %arg5: memref<1x128xf32, #tpu.memory_space<vmem>>, %arg6: memref<8x128xf32, #tpu.memory_space<vmem>>) attributes {dimension_semantics = [#tpu.dimension_semantics<parallel>], iteration_bounds = array<i64: 1>, scalar_prefetch = 0 : i64, scratch_operands = 0 : i64, tpu.core_type = #tpu.core_type<tc>, window_params = [{transform_indices = @transform_0, window_bounds = array<i64: 8, 512>}, {pipeline_mode = #tpu.pipeline_mode<synchronous>, transform_indices = @transform_1, window_bounds = array<i64: 512, 512>}, {pipeline_mode = #tpu.pipeline_mode<synchronous>, transform_indices = @transform_2, window_bounds = array<i64: 1, 512>}, {pipeline_mode = #tpu.pipeline_mode<synchronous>, transform_indices = @transform_3, window_bounds = array<i64: 512, 128>}, {pipeline_mode = #tpu.pipeline_mode<synchronous>, transform_indices = @transform_4, window_bounds = array<i64: 1, 128>}, {transform_indices = @transform_5, window_bounds = array<i64: 8, 128>}]} {
    %c0 = arith.constant 0 : index
    %c0_0 = arith.constant 0 : index
    %0 = vector.load %arg1[%c0, %c0_0] : memref<8x512xbf16, #tpu.memory_space<vmem>>, vector<8x512xbf16>
    %c0_1 = arith.constant 0 : index
    %c0_2 = arith.constant 0 : index
    %1 = vector.load %arg2[%c0_1, %c0_2] : memref<512x512xbf16, #tpu.memory_space<vmem>>, vector<512x512xbf16>
    %cst = arith.constant dense<0.000000e+00> : vector<8x512xf32>
    %2 = tpu.matmul %0, %1, %cst {dimension_numbers = #tpu.dot_dimension_numbers<[1], [0], [0], [1], [0, 0, 1, 1], [], []>} : vector<8x512xbf16>, vector<512x512xbf16>, vector<8x512xf32> -> vector<8x512xf32>
    %c0_3 = arith.constant 0 : index
    %c0_4 = arith.constant 0 : index
    %3 = vector.load %arg3[%c0_3, %c0_4] : memref<1x512xf32, #tpu.memory_space<vmem>>, vector<1x512xf32>
    %4 = vector.broadcast %3 : vector<1x512xf32> to vector<8x512xf32>
    %5 = arith.addf %2, %4 : vector<8x512xf32>
    %cst_5 = arith.constant 0.000000e+00 : f32
    %6 = vector.broadcast %cst_5 : f32 to vector<8x512xf32>
    %7 = arith.maximumf %5, %6 : vector<8x512xf32>
    %8 = arith.truncf %7 : vector<8x512xf32> to vector<8x512xbf16>
    %c0_6 = arith.constant 0 : index
    %c0_7 = arith.constant 0 : index
    %9 = vector.load %arg4[%c0_6, %c0_7] : memref<512x128xbf16, #tpu.memory_space<vmem>>, vector<512x128xbf16>
    %cst_8 = arith.constant dense<0.000000e+00> : vector<8x128xf32>
    %10 = tpu.matmul %8, %9, %cst_8 {dimension_numbers = #tpu.dot_dimension_numbers<[1], [0], [0], [1], [0, 0, 1, 1], [], []>} : vector<8x512xbf16>, vector<512x128xbf16>, vector<8x128xf32> -> vector<8x128xf32>
    %c0_9 = arith.constant 0 : index
    %c0_10 = arith.constant 0 : index
    %11 = vector.load %arg5[%c0_9, %c0_10] : memref<1x128xf32, #tpu.memory_space<vmem>>, vector<1x128xf32>
    %12 = vector.broadcast %11 : vector<1x128xf32> to vector<8x128xf32>
    %13 = arith.addf %10, %12 : vector<8x128xf32>
    %cst_11 = arith.constant 0.000000e+00 : f32
    %14 = vector.broadcast %cst_11 : f32 to vector<8x128xf32>
    %15 = arith.maximumf %13, %14 : vector<8x128xf32>
    %c0_12 = arith.constant 0 : index
    %c0_13 = arith.constant 0 : index
    %16 = vector.load %arg6[%c0_12, %c0_13] : memref<8x128xf32, #tpu.memory_space<vmem>>, vector<8x128xf32>
    tpu.vector_store %arg6[%c0_12, %c0_13], %15 {strides = array<i32>} : memref<8x128xf32, #tpu.memory_space<vmem>>, vector<8x128xf32>,
    return
  }
  func.func @transform_0(%arg0: i32) -> (i32, i32) {
    %c0_i32 = arith.constant 0 : i32
    %c0_i32_0 = arith.constant 0 : i32
    return %arg0, %c0_i32 : i32, i32
  }
  func.func @transform_1(%arg0: i32) -> (i32, i32) {
    %c0_i32 = arith.constant 0 : i32
    %c0_i32_0 = arith.constant 0 : i32
    %c0_i32_1 = arith.constant 0 : i32
    return %c0_i32, %c0_i32_0 : i32, i32
  }
  func.func @transform_2(%arg0: i32) -> (i32, i32) {
    %c0_i32 = arith.constant 0 : i32
    %c0_i32_0 = arith.constant 0 : i32
    %c0_i32_1 = arith.constant 0 : i32
    return %c0_i32, %c0_i32_0 : i32, i32
  }
  func.func @transform_3(%arg0: i32) -> (i32, i32) {
    %c0_i32 = arith.constant 0 : i32
    %c0_i32_0 = arith.constant 0 : i32
    %c0_i32_1 = arith.constant 0 : i32
    return %c0_i32, %c0_i32_0 : i32, i32
  }
  func.func @transform_4(%arg0: i32) -> (i32, i32) {
    %c0_i32 = arith.constant 0 : i32
    %c0_i32_0 = arith.constant 0 : i32
    %c0_i32_1 = arith.constant 0 : i32
    return %c0_i32, %c0_i32_0 : i32, i32
  }
  func.func @transform_5(%arg0: i32) -> (i32, i32) {
    %c0_i32 = arith.constant 0 : i32
    %c0_i32_0 = arith.constant 0 : i32
    return %arg0, %c0_i32 : i32, i32
  }
}

</mosaic_0001>

<bundles_post_ra>
// kernel: tpu_custom_call.1
= control target key start
LH: loop header
LB: loop body
LE: loop exit
PB: predicated region body
PF: predicated region fallthrough
CT: control target
= control target key end

     0   :  { %10 = vsyncpa [#allocation3], 0  ;;  %s2049_s0 = inlined_call_operand.hbm [shape: bf16[8,512], index: 0, kind: input, shape index: {}]   ;;  %s2050_s1 = inlined_call_operand.hbm [shape: bf16[512,512], index: 1, kind: input, shape index: {}]   ;;  %s2051_s2 = inlined_call_operand.vmem [shape: f32[1,512], index: 2, kind: input, shape index: {}]   ;;  %s2052_s3 = inlined_call_operand.hbm [shape: bf16[512,128], index: 3, kind: input, shape index: {}]   ;;  %s2053_s4 = inlined_call_operand.vmem [shape: f32[1,128], index: 4, kind: input, shape index: {}]   ;;  %s2054_s5 = inlined_call_operand.hbm [shape: f32[8,128], index: 5, kind: output, shape index: {}]  }
   0x1   :  { %11 = vsyncpa [#allocation6], 0 }
   0x2   :  { %12 = vsyncpa [#allocation4], 0  ;;  %s1951_s18 = smov [#allocation5]   ;;  %s1857_s22 = scalar_lea.hbm %s2050_s1, 16384 }
   0x3   :  { %s28_s19 = sshll.u32 %s1951_s18, 4  ;;  %p1858_p0 = scmp.ne.s32.totalorder %s2050_s1, %s1857_s22  ;;  %s29_s19 = int_to_ptr.vmem [resolvable:$true] %s28_s19 }
   0x4   :  { %p1861_p1 = scmp.lt.u32.totalorder %s1857_s22, %s2050_s1 }
   0x6   :  { %p1863_p2 = pnand %p1861_p1, %p1858_p0 }
   0x8   :  { %1866 = shalt.err (!%p1863_p2)
}
   0x9   :  { %s1867_s27 = scalar_lea.vmem %s29_s19, 16384  ;;  %p1872_p4 = scmp.lt.s32.totalorder %s29_s19, %s29_s19 }
   0xa   :  { %p1868_p3 = scmp.ne.s32.totalorder %s29_s19, %s1867_s27  ;;  %p1873_p5 = scmp.lt.s32.totalorder %s1867_s27, %s1867_s27 }
   0xc   :  { %p1874_p6 = por %p1873_p5, %p1872_p4 }
   0xe   :  { %p1875_p7 = pnand %p1874_p6, %p1868_p3 }
  0x10   :  { %1878 = shalt.err (!%p1875_p7)
}
  0x11   :  { %s1952_s28 = smov 256   ;;  %s1953_s29 = smov 16  }
  0x12   :  { %34 = dma.hbm_to_vmem [thread:$0]  %s2050_s1, 16384, %s29_s19, [#allocation6], %s1952_s28, %s1952_s28, %s1953_s29  }
  0x13   :  { %s1954_s7 = smov [#allocation2]   ;;  %s1955_s9 = smov [#allocation7]  }
  0x14   :  { %s19_s8 = sshll.u32 %s1954_s7, 4  ;;  %s42_s10 = sshll.u32 %s1955_s9, 4  ;;  %s20_s8 = int_to_ptr.vmem [resolvable:$true] %s19_s8  ;;  %s43_s10 = int_to_ptr.vmem [resolvable:$true] %s42_s10 }
  0x15   :  { %s1879_s13 = scalar_lea.hbm %s2049_s0, 256 }
  0x16   :  { %p1880_p8 = scmp.ne.s32.totalorder %s2049_s0, %s1879_s13  ;;  %p1883_p9 = scmp.lt.u32.totalorder %s1879_s13, %s2049_s0 }
  0x18   :  { %p1885_p10 = pnand %p1883_p9, %p1880_p8 }
  0x1a   :  { %1888 = shalt.err (!%p1885_p10)
}
  0x1b   :  { %s1889_s1 = scalar_lea.vmem %s20_s8, 256  ;;  %p1894_p12 = scmp.lt.s32.totalorder %s20_s8, %s20_s8 }
  0x1c   :  { %p1890_p11 = scmp.ne.s32.totalorder %s20_s8, %s1889_s1  ;;  %p1895_p13 = scmp.lt.s32.totalorder %s1889_s1, %s1889_s1 }
  0x1e   :  { %p1896_p0 = por %p1895_p13, %p1894_p12 }
  0x20   :  { %p1897_p1 = pnand %p1896_p0, %p1890_p11 }
  0x22   :  { %1900 = shalt.err (!%p1897_p1)
}
  0x23   :  { %22 = dma.hbm_to_vmem [thread:$0]  %s2049_s0, 256, %s20_s8, [#allocation3]  }
  0x24   :  { %s1901_s22 = scalar_lea.hbm %s2052_s3, 4096 }
  0x25   :  { %p1902_p2 = scmp.ne.s32.totalorder %s2052_s3, %s1901_s22  ;;  %p1905_p3 = scmp.lt.u32.totalorder %s1901_s22, %s2052_s3 }
  0x27   :  { %p1907_p4 = pnand %p1905_p3, %p1902_p2 }
  0x29   :  { %1910 = shalt.err (!%p1907_p4)
}
  0x2a   :  { %s1911_s27 = scalar_lea.vmem %s43_s10, 4096  ;;  %p1916_p6 = scmp.lt.s32.totalorder %s43_s10, %s43_s10 }
  0x2b   :  { %p1912_p5 = scmp.ne.s32.totalorder %s43_s10, %s1911_s27  ;;  %p1917_p7 = scmp.lt.s32.totalorder %s1911_s27, %s1911_s27 }
  0x2d   :  { %p1918_p8 = por %p1917_p7, %p1916_p6 }
  0x2f   :  { %p1919_p9 = pnand %p1918_p8, %p1912_p5 }
  0x31   :  { %1922 = shalt.err (!%p1919_p9)
}
  0x32   :  { %s1956_s0 = smov 64   ;;  %s1957_s28 = smov 4  }
  0x33   :  { %48 = dma.hbm_to_vmem [thread:$0]  %s2052_s3, 4096, %s43_s10, [#allocation6], %s1956_s0, %s1956_s0, %s1957_s28  }
  0x34   :  { %1945 = dma.done.wait [#allocation3], 256  }
  0x35   :  { %1946 = vsyncadd [#allocation3], 4294967040 }
  0x36   :  { %1947 = dma.done.wait [#allocation6], 20480  }
  0x37   :  { %1948 = vsyncadd [#allocation6], 4294946816  ;;  %v1629_v0 = vld [vmem:[#allocation5 + $0x4] ss:$16 sps:$4 sm:$0xff]   ;;  %v1631_v1 = vld [vmem:[#allocation5 + $0xc] ss:$16 sps:$4 sm:$0xff]  }
  0x38   :  { %867 = vmatprep.subr.bf16.mxu0 %v1629_v0  ;;  %v1633_v2 = vld [vmem:[#allocation5] ss:$16 sps:$4 sm:$0xff]   ;;  %v1634_v3 = vld [vmem:[#allocation5 + $0x8] ss:$16 sps:$4 sm:$0xff]   ;;  %949 = vmatprep.subr.bf16.mxu1 %v1631_v1  ;;  %v1635_v4 = vld [vmem:[#allocation5 + $0x24] ss:$16 sps:$4 sm:$0xff]  }
  0x39   :  { %868 = vmatpush1.bf16.msra.mxu0 %v1633_v2  ;;  %950 = vmatpush1.bf16.msra.mxu1 %v1634_v3  ;;  %v1637_v5 = vld [vmem:[#allocation5 + $0x2c] ss:$16 sps:$4 sm:$0xff]   ;;  %v1639_v6 = vld [vmem:[#allocation5 + $0x20] ss:$16 sps:$4 sm:$0xff]   ;;  %v1640_v7 = vld [vmem:[#allocation5 + $0x28] ss:$16 sps:$4 sm:$0xff]  }
  0x3a   :  { %869 = vmatprep.subr.bf16.mxu0 %v1635_v4  ;;  %951 = vmatprep.subr.bf16.mxu1 %v1637_v5  ;;  %v1641_v8 = vld [vmem:[#allocation5 + $0x44] ss:$16 sps:$4 sm:$0xff]   ;;  %v1643_v9 = vld [vmem:[#allocation5 + $0x4c] ss:$16 sps:$4 sm:$0xff]   ;;  %v1645_v10 = vld [vmem:[#allocation5 + $0x40] ss:$16 sps:$4 sm:$0xff]  }
  0x3b   :  { %v1646_v11 = vld [vmem:[#allocation5 + $0x48] ss:$16 sps:$4 sm:$0xff]   ;;  %v1647_v12 = vld [vmem:[#allocation5 + $0x64] ss:$16 sps:$4 sm:$0xff]   ;;  %v1649_v13 = vld [vmem:[#allocation5 + $0x6c] ss:$16 sps:$4 sm:$0xff]  }
  0x3c   :  { %v1651_v14 = vld [vmem:[#allocation5 + $0x60] ss:$16 sps:$4 sm:$0xff]   ;;  %v1652_v15 = vld [vmem:[#allocation5 + $0x68] ss:$16 sps:$4 sm:$0xff]   ;;  %v1653_v16 = vld [vmem:[#allocation5 + $0x84] ss:$16 sps:$4 sm:$0xff]  }
  0x3d   :  { %870 = vmatpush1.bf16.msra.mxu0 %v1639_v6  ;;  %952 = vmatpush1.bf16.msra.mxu1 %v1640_v7  ;;  %v1655_v17 = vld [vmem:[#allocation5 + $0x8c] ss:$16 sps:$4 sm:$0xff]   ;;  %v1657_v18 = vld [vmem:[#allocation5 + $0x80] ss:$16 sps:$4 sm:$0xff]   ;;  %v1658_v19 = vld [vmem:[#allocation5 + $0x88] ss:$16 sps:$4 sm:$0xff]  }
  0x3e   :  { %871 = vmatprep.subr.bf16.mxu0 %v1641_v8  ;;  %953 = vmatprep.subr.bf16.mxu1 %v1643_v9  ;;  %v1659_v20 = vld [vmem:[#allocation5 + $0xa4] ss:$16 sps:$4 sm:$0xff]   ;;  %v1661_v21 = vld [vmem:[#allocation5 + $0xac] ss:$16 sps:$4 sm:$0xff]   ;;  %v1663_v22 = vld [vmem:[#allocation5 + $0xa0] ss:$16 sps:$4 sm:$0xff]  }
  0x3f   :  { %v1664_v23 = vld [vmem:[#allocation5 + $0xa8] ss:$16 sps:$4 sm:$0xff]   ;;  %v1665_v24 = vld [vmem:[#allocation5 + $0xc4] ss:$16 sps:$4 sm:$0xff]   ;;  %v1667_v25 = vld [vmem:[#allocation5 + $0xcc] ss:$16 sps:$4 sm:$0xff]  }
  0x40   :  { %v1669_v26 = vld [vmem:[#allocation5 + $0xc0] ss:$16 sps:$4 sm:$0xff]   ;;  %v1670_v27 = vld [vmem:[#allocation5 + $0xc8] ss:$16 sps:$4 sm:$0xff]   ;;  %v1671_v28 = vld [vmem:[#allocation5 + $0xe4] ss:$16 sps:$4 sm:$0xff]  }
  0x41   :  { %872 = vmatpush1.bf16.msra.mxu0 %v1645_v10  ;;  %954 = vmatpush1.bf16.msra.mxu1 %v1646_v11  ;;  %v1673_v29 = vld [vmem:[#allocation5 + $0xec] ss:$16 sps:$4 sm:$0xff]   ;;  %v1675_v30 = vld [vmem:[#allocation5 + $0xe0] ss:$16 sps:$4 sm:$0xff]   ;;  %v1676_v31 = vld [vmem:[#allocation5 + $0xe8] ss:$16 sps:$4 sm:$0xff]  }
  0x42   :  { %873 = vmatprep.subr.bf16.mxu0 %v1647_v12  ;;  %955 = vmatprep.subr.bf16.mxu1 %v1649_v13  ;;  %v1677_v32 = vld [vmem:[#allocation5 + $0x104] ss:$16 sps:$4 sm:$0xff]   ;;  %v1679_v33 = vld [vmem:[#allocation5 + $0x10c] ss:$16 sps:$4 sm:$0xff]   ;;  %v1681_v34 = vld [vmem:[#allocation5 + $0x100] ss:$16 sps:$4 sm:$0xff]  }
  0x43   :  { %v1682_v35 = vld [vmem:[#allocation5 + $0x108] ss:$16 sps:$4 sm:$0xff]   ;;  %v1683_v36 = vld [vmem:[#allocation5 + $0x124] ss:$16 sps:$4 sm:$0xff]   ;;  %v1685_v37 = vld [vmem:[#allocation5 + $0x12c] ss:$16 sps:$4 sm:$0xff]  }
  0x44   :  { %v1687_v38 = vld [vmem:[#allocation5 + $0x120] ss:$16 sps:$4 sm:$0xff]   ;;  %v1688_v39 = vld [vmem:[#allocation5 + $0x128] ss:$16 sps:$4 sm:$0xff]   ;;  %v1689_v40 = vld [vmem:[#allocation5 + $0x144] ss:$16 sps:$4 sm:$0xff]  }
  0x45   :  { %874 = vmatpush1.bf16.msra.mxu0 %v1651_v14  ;;  %956 = vmatpush1.bf16.msra.mxu1 %v1652_v15  ;;  %v1691_v41 = vld [vmem:[#allocation5 + $0x14c] ss:$16 sps:$4 sm:$0xff]   ;;  %v1693_v42 = vld [vmem:[#allocation5 + $0x140] ss:$16 sps:$4 sm:$0xff]   ;;  %v1694_v43 = vld [vmem:[#allocation5 + $0x148] ss:$16 sps:$4 sm:$0xff]  }
  0x46   :  { %875 = vmatprep.subr.bf16.mxu0 %v1653_v16  ;;  %957 = vmatprep.subr.bf16.mxu1 %v1655_v17  ;;  %v1695_v44 = vld [vmem:[#allocation5 + $0x164] ss:$16 sps:$4 sm:$0xff]   ;;  %v1697_v45 = vld [vmem:[#allocation5 + $0x16c] ss:$16 sps:$4 sm:$0xff]   ;;  %v1699_v47 = vld [vmem:[#allocation5 + $0x160] ss:$16 sps:$4 sm:$0xff]  }
  0x47   :  { %v61_v46 = vld [vmem:[#allocation2] sm:$0xff]  ;;  %v1700_v49 = vld [vmem:[#allocation5 + $0x168] ss:$16 sps:$4 sm:$0xff]   ;;  %v1703_v51 = vld [vmem:[#allocation5 + $0x18c] ss:$16 sps:$4 sm:$0xff]   ;;  %s1958_s8 = smov [#allocation8]  }
  0x48   :  { %v1401_v48 = vcombine.high %v61_v46, %v61_v46  ;;  %v1701_v50 = vld [vmem:[#allocation5 + $0x184] ss:$16 sps:$4 sm:$0xff]   ;;  %v1705_v52 = vld [vmem:[#allocation5 + $0x180] ss:$16 sps:$4 sm:$0xff]   ;;  %v1706_v53 = vld [vmem:[#allocation5 + $0x188] ss:$16 sps:$4 sm:$0xff]   ;;  %v1400_v4 = vcombine.low %v61_v46, %v61_v46 }
  0x49   :  { %876 = vmatpush1.bf16.msra.mxu0 %v1657_v18  ;;  %958 = vmatpush1.bf16.msra.mxu1 %v1658_v19  ;;  %v1707_v54 = vld [vmem:[#allocation5 + $0x1a4] ss:$16 sps:$4 sm:$0xff]   ;;  %v1709_v55 = vld [vmem:[#allocation5 + $0x1ac] ss:$16 sps:$4 sm:$0xff]   ;;  %v1711_v56 = vld [vmem:[#allocation5 + $0x1a0] ss:$16 sps:$4 sm:$0xff]  }
  0x4a   :  { %877 = vmatprep.subr.bf16.mxu0 %v1659_v20  ;;  %959 = vmatprep.subr.bf16.mxu1 %v1661_v21  ;;  %v1712_v57 = vld [vmem:[#allocation5 + $0x1a8] ss:$16 sps:$4 sm:$0xff]   ;;  %v1713_v58 = vld [vmem:[#allocation5 + $0x1c4] ss:$16 sps:$4 sm:$0xff]   ;;  %v1715_v59 = vld [vmem:[#allocation5 + $0x1cc] ss:$16 sps:$4 sm:$0xff]  }
  0x4b   :  { %899 = vmatprep.mubr.bf16.mxu0 %v1401_v48  ;;  %981 = vmatprep.mubr.bf16.mxu1 %v1401_v48  ;;  %v1717_v60 = vld [vmem:[#allocation5 + $0x1c0] ss:$16 sps:$4 sm:$0xff]   ;;  %v1718_v61 = vld [vmem:[#allocation5 + $0x1c8] ss:$16 sps:$4 sm:$0xff]   ;;  %v1719_v62 = vld [vmem:[#allocation5 + $0x1e4] ss:$16 sps:$4 sm:$0xff]  }
  0x4c   :  { %v1721_v63 = vld [vmem:[#allocation5 + $0x1ec] ss:$16 sps:$4 sm:$0xff]   ;;  %v1723_v0 = vld [vmem:[#allocation5 + $0x1e0] ss:$16 sps:$4 sm:$0xff]   ;;  %v1724_v1 = vld [vmem:[#allocation5 + $0x1e8] ss:$16 sps:$4 sm:$0xff]  }
  0x4d   :  { %878 = vmatpush1.bf16.msra.mxu0 %v1663_v22  ;;  %960 = vmatpush1.bf16.msra.mxu1 %v1664_v23  ;;  %v1729_v2 = vld [vmem:[#allocation5 + $0x204] ss:$16 sps:$4 sm:$0xff]   ;;  %v1732_v3 = vld [vmem:[#allocation5 + $0x20c] ss:$16 sps:$4 sm:$0xff]   ;;  %v1727_v5 = vld [vmem:[#allocation5 + $0x200] ss:$16 sps:$4 sm:$0xff]  }
  0x4e   :  { %879 = vmatprep.subr.bf16.mxu0 %v1665_v24  ;;  %961 = vmatprep.subr.bf16.mxu1 %v1667_v25  ;;  %v1730_v6 = vld [vmem:[#allocation5 + $0x208] ss:$16 sps:$4 sm:$0xff]   ;;  %v1735_v7 = vld [vmem:[#allocation5 + $0x224] ss:$16 sps:$4 sm:$0xff]   ;;  %v1738_v8 = vld [vmem:[#allocation5 + $0x22c] ss:$16 sps:$4 sm:$0xff]  }
  0x4f   :  { %v1733_v9 = vld [vmem:[#allocation5 + $0x220] ss:$16 sps:$4 sm:$0xff]   ;;  %v1736_v10 = vld [vmem:[#allocation5 + $0x228] ss:$16 sps:$4 sm:$0xff]   ;;  %v1741_v11 = vld [vmem:[#allocation5 + $0x244] ss:$16 sps:$4 sm:$0xff]  }
  0x50   :  { %v1744_v12 = vld [vmem:[#allocation5 + $0x24c] ss:$16 sps:$4 sm:$0xff]   ;;  %v1739_v13 = vld [vmem:[#allocation5 + $0x240] ss:$16 sps:$4 sm:$0xff]   ;;  %v1742_v14 = vld [vmem:[#allocation5 + $0x248] ss:$16 sps:$4 sm:$0xff]  }
  0x51   :  { %880 = vmatpush1.bf16.msra.mxu0 %v1669_v26  ;;  %962 = vmatpush1.bf16.msra.mxu1 %v1670_v27  ;;  %v1747_v15 = vld [vmem:[#allocation5 + $0x264] ss:$16 sps:$4 sm:$0xff]   ;;  %v1750_v16 = vld [vmem:[#allocation5 + $0x26c] ss:$16 sps:$4 sm:$0xff]   ;;  %v1745_v17 = vld [vmem:[#allocation5 + $0x260] ss:$16 sps:$4 sm:$0xff]  }
  0x52   :  { %881 = vmatprep.subr.bf16.mxu0 %v1671_v28  ;;  %963 = vmatprep.subr.bf16.mxu1 %v1673_v29  ;;  %v1748_v18 = vld [vmem:[#allocation5 + $0x268] ss:$16 sps:$4 sm:$0xff]   ;;  %v1753_v19 = vld [vmem:[#allocation5 + $0x284] ss:$16 sps:$4 sm:$0xff]   ;;  %v1756_v20 = vld [vmem:[#allocation5 + $0x28c] ss:$16 sps:$4 sm:$0xff]  }
  0x53   :  { %v1751_v21 = vld [vmem:[#allocation5 + $0x280] ss:$16 sps:$4 sm:$0xff]   ;;  %v1754_v22 = vld [vmem:[#allocation5 + $0x288] ss:$16 sps:$4 sm:$0xff]   ;;  %v1759_v23 = vld [vmem:[#allocation5 + $0x2a4] ss:$16 sps:$4 sm:$0xff]  }
  0x54   :  { %v1762_v24 = vld [vmem:[#allocation5 + $0x2ac] ss:$16 sps:$4 sm:$0xff]   ;;  %v1757_v25 = vld [vmem:[#allocation5 + $0x2a0] ss:$16 sps:$4 sm:$0xff]   ;;  %v1760_v26 = vld [vmem:[#allocation5 + $0x2a8] ss:$16 sps:$4 sm:$0xff]  }
  0x55   :  { %882 = vmatpush1.bf16.msra.mxu0 %v1675_v30  ;;  %964 = vmatpush1.bf16.msra.mxu1 %v1676_v31  ;;  %v1765_v27 = vld [vmem:[#allocation5 + $0x2c4] ss:$16 sps:$4 sm:$0xff]   ;;  %v1768_v28 = vld [vmem:[#allocation5 + $0x2cc] ss:$16 sps:$4 sm:$0xff]   ;;  %v1763_v30 = vld [vmem:[#allocation5 + $0x2c0] ss:$16 sps:$4 sm:$0xff]  }
  0x56   :  { %883 = vmatprep.subr.bf16.mxu0 %v1677_v32  ;;  %965 = vmatprep.subr.bf16.mxu1 %v1679_v33  ;;  %v2025_v29 = vld [vmem:[#allocation2 + $0x8] sm:$0xff]  ;;  %v1771_v33 = vld [vmem:[#allocation5 + $0x2e4] ss:$16 sps:$4 sm:$0xff]   ;;  %s1390_s9 = sshll.u32 %s1958_s8, 4  ;;  %s1391_s9 = int_to_ptr.vmem [resolvable:$true] %s1390_s9 }
  0x57   :  { %v1403_v31 = vcombine.high %v2025_v29, %v2025_v29  ;;  %v1766_v32 = vld [vmem:[#allocation5 + $0x2c8] ss:$16 sps:$4 sm:$0xff]   ;;  %v1792_v46 = vld [vmem:[#allocation5 + $0x34c] ss:$16 sps:$4 sm:$0xff]   ;;  %s1923_s10 = scalar_lea.vmem %s1391_s9, 128  ;;  %p1928_p11 = scmp.lt.s32.totalorder %s1391_s9, %s1391_s9 }
  0x58   :  { %v1790_v48 = vld [vmem:[#allocation5 + $0x348] ss:$16 sps:$4 sm:$0xff]   ;;  %p1924_p10 = scmp.ne.s32.totalorder %s1391_s9, %s1923_s10  ;;  %p1929_p12 = scmp.lt.s32.totalorder %s1923_s10, %s1923_s10 }
  0x59   :  { %884 = vmatpush1.bf16.msra.mxu0 %v1681_v34  ;;  %966 = vmatpush1.bf16.msra.mxu1 %v1682_v35  ;;  %v1774_v34 = vld [vmem:[#allocation5 + $0x2ec] ss:$16 sps:$4 sm:$0xff]   ;;  %v1769_v35 = vld [vmem:[#allocation5 + $0x2e0] ss:$16 sps:$4 sm:$0xff]  }
  0x5a   :  { %885 = vmatprep.subr.bf16.mxu0 %v1683_v36  ;;  %967 = vmatprep.subr.bf16.mxu1 %v1685_v37  ;;  %v1772_v36 = vld [vmem:[#allocation5 + $0x2e8] ss:$16 sps:$4 sm:$0xff]   ;;  %v1777_v37 = vld [vmem:[#allocation5 + $0x304] ss:$16 sps:$4 sm:$0xff]   ;;  %p1930_p13 = por %p1929_p12, %p1928_p11 }
  0x5c   :  { %p1931_p0 = pnand %p1930_p13, %p1924_p10 }
  0x5d   :  { %886 = vmatpush1.bf16.msra.mxu0 %v1687_v38  ;;  %968 = vmatpush1.bf16.msra.mxu1 %v1688_v39  ;;  %v1780_v38 = vld [vmem:[#allocation5 + $0x30c] ss:$16 sps:$4 sm:$0xff]   ;;  %v1775_v39 = vld [vmem:[#allocation5 + $0x300] ss:$16 sps:$4 sm:$0xff]  }
  0x5e   :  { %887 = vmatprep.subr.bf16.mxu0 %v1689_v40  ;;  %969 = vmatprep.subr.bf16.mxu1 %v1691_v41  ;;  %v1778_v40 = vld [vmem:[#allocation5 + $0x308] ss:$16 sps:$4 sm:$0xff]   ;;  %v1783_v41 = vld [vmem:[#allocation5 + $0x324] ss:$16 sps:$4 sm:$0xff]  }
  0x61   :  { %888 = vmatpush1.bf16.msra.mxu0 %v1693_v42  ;;  %970 = vmatpush1.bf16.msra.mxu1 %v1694_v43  ;;  %v1786_v42 = vld [vmem:[#allocation5 + $0x32c] ss:$16 sps:$4 sm:$0xff]   ;;  %v1781_v43 = vld [vmem:[#allocation5 + $0x320] ss:$16 sps:$4 sm:$0xff]  }
  0x62   :  { %889 = vmatprep.subr.bf16.mxu0 %v1695_v44  ;;  %971 = vmatprep.subr.bf16.mxu1 %v1697_v45  ;;  %v1784_v44 = vld [vmem:[#allocation5 + $0x328] ss:$16 sps:$4 sm:$0xff]   ;;  %v1789_v45 = vld [vmem:[#allocation5 + $0x344] ss:$16 sps:$4 sm:$0xff]  }
  0x65   :  { %890 = vmatpush1.bf16.msra.mxu0 %v1699_v47  ;;  %972 = vmatpush1.bf16.msra.mxu1 %v1700_v49  ;;  %v1787_v47 = vld [vmem:[#allocation5 + $0x340] ss:$16 sps:$4 sm:$0xff]   ;;  %v1795_v49 = vld [vmem:[#allocation5 + $0x364] ss:$16 sps:$4 sm:$0xff]  }
  0x66   :  { %891 = vmatprep.subr.bf16.mxu0 %v1701_v50  ;;  %973 = vmatprep.subr.bf16.mxu1 %v1703_v51  ;;  %v1798_v50 = vld [vmem:[#allocation5 + $0x36c] ss:$16 sps:$4 sm:$0xff]   ;;  %v1793_v51 = vld [vmem:[#allocation5 + $0x360] ss:$16 sps:$4 sm:$0xff]  }
  0x69   :  { %892 = vmatpush1.bf16.msra.mxu0 %v1705_v52  ;;  %974 = vmatpush1.bf16.msra.mxu1 %v1706_v53  ;;  %v1796_v52 = vld [vmem:[#allocation5 + $0x368] ss:$16 sps:$4 sm:$0xff]   ;;  %v1801_v53 = vld [vmem:[#allocation5 + $0x384] ss:$16 sps:$4 sm:$0xff]  }
  0x6a   :  { %893 = vmatprep.subr.bf16.mxu0 %v1707_v54  ;;  %975 = vmatprep.subr.bf16.mxu1 %v1709_v55  ;;  %v1804_v54 = vld [vmem:[#allocation5 + $0x38c] ss:$16 sps:$4 sm:$0xff]   ;;  %v1799_v55 = vld [vmem:[#allocation5 + $0x380] ss:$16 sps:$4 sm:$0xff]  }
  0x6d   :  { %894 = vmatpush1.bf16.msra.mxu0 %v1711_v56  ;;  %976 = vmatpush1.bf16.msra.mxu1 %v1712_v57  ;;  %v1802_v56 = vld [vmem:[#allocation5 + $0x388] ss:$16 sps:$4 sm:$0xff]   ;;  %v1807_v57 = vld [vmem:[#allocation5 + $0x3a4] ss:$16 sps:$4 sm:$0xff]  }
  0x6e   :  { %895 = vmatprep.subr.bf16.mxu0 %v1713_v58  ;;  %977 = vmatprep.subr.bf16.mxu1 %v1715_v59  ;;  %v1810_v58 = vld [vmem:[#allocation5 + $0x3ac] ss:$16 sps:$4 sm:$0xff]   ;;  %v1805_v59 = vld [vmem:[#allocation5 + $0x3a0] ss:$16 sps:$4 sm:$0xff]  }
  0x71   :  { %896 = vmatpush1.bf16.msra.mxu0 %v1717_v60  ;;  %978 = vmatpush1.bf16.msra.mxu1 %v1718_v61  ;;  %v1808_v60 = vld [vmem:[#allocation5 + $0x3a8] ss:$16 sps:$4 sm:$0xff]   ;;  %v1813_v61 = vld [vmem:[#allocation5 + $0x3c4] ss:$16 sps:$4 sm:$0xff]  }
  0x72   :  { %897 = vmatprep.subr.bf16.mxu0 %v1719_v62  ;;  %979 = vmatprep.subr.bf16.mxu1 %v1721_v63  ;;  %v1816_v62 = vld [vmem:[#allocation5 + $0x3cc] ss:$16 sps:$4 sm:$0xff]   ;;  %v1811_v63 = vld [vmem:[#allocation5 + $0x3c0] ss:$16 sps:$4 sm:$0xff]  }
  0x75   :  { %898 = vmatpush1.bf16.msra.mxu0 %v1723_v0  ;;  %980 = vmatpush1.bf16.msra.mxu1 %v1724_v1  ;;  %v1814_v0 = vld [vmem:[#allocation5 + $0x3c8] ss:$16 sps:$4 sm:$0xff]   ;;  %v1819_v1 = vld [vmem:[#allocation5 + $0x3e4] ss:$16 sps:$4 sm:$0xff]  }
  0x76   :  { %908 = vmatprep.subr.bf16.mxu0 %v1729_v2  ;;  %990 = vmatprep.subr.bf16.mxu1 %v1732_v3  ;;  %v1822_v2 = vld [vmem:[#allocation5 + $0x3ec] ss:$16 sps:$4 sm:$0xff]   ;;  %v1817_v3 = vld [vmem:[#allocation5 + $0x3e0] ss:$16 sps:$4 sm:$0xff]  }
  0x78   :  { %900 = vmatmul.mubr.bf16.vlgmr.msra.gmra.mrb[0].mxu0 %v1400_v4  ;;  %982 = vmatmul.mubr.bf16.vlgmr.msra.gmra.mrb[0].mxu1 %v1400_v4  ;;  %v1820_v4 = vld [vmem:[#allocation5 + $0x3e8] ss:$16 sps:$4 sm:$0xff]  }
  0x79   :  { %909 = vmatpush1.bf16.msra.mxu0 %v1727_v5  ;;  %991 = vmatpush1.bf16.msra.mxu1 %v1730_v6  ;;  %v1825_v5 = vld [vmem:[#allocation7 + $0x40] sm:$0xff]  }
  0x7a   :  { %910 = vmatprep.subr.bf16.mxu0 %v1735_v7  ;;  %992 = vmatprep.subr.bf16.mxu1 %v1738_v8  ;;  %v1826_v6 = vld [vmem:[#allocation7 + $0xc0] sm:$0xff]   ;;  %v1402_v7 = vcombine.low %v2025_v29, %v2025_v29  ;;  %v1848_v29 = vld [vmem:[#allocation7 + $0xa8] sm:$0xff]  }
  0x7b   :  { %940 = vmatprep.mubr.bf16.mxu0 %v1403_v31  ;;  %1022 = vmatprep.mubr.bf16.mxu1 %v1403_v31  ;;  %v1827_v8 = vld [vmem:[#allocation7] sm:$0xff]   ;;  %v1850_v31 = vld [vmem:[#allocation7 + $0xf0] sm:$0xff]  }
  0x7d   :  { %911 = vmatpush1.bf16.msra.mxu0 %v1733_v9  ;;  %993 = vmatpush1.bf16.msra.mxu1 %v1736_v10  ;;  %v1828_v9 = vld [vmem:[#allocation7 + $0x80] sm:$0xff]   ;;  %v1829_v10 = vld [vmem:[#allocation7 + $0x48] sm:$0xff]  }
  0x7e   :  { %912 = vmatprep.subr.bf16.mxu0 %v1741_v11  ;;  %994 = vmatprep.subr.bf16.mxu1 %v1744_v12  ;;  %v1830_v11 = vld [vmem:[#allocation7 + $0xc8] sm:$0xff]  }
  0x7f   :  { %v1831_v12 = vld [vmem:[#allocation7 + $0x8] sm:$0xff]  }
  0x81   :  { %913 = vmatpush1.bf16.msra.mxu0 %v1739_v13  ;;  %995 = vmatpush1.bf16.msra.mxu1 %v1742_v14  ;;  %v1832_v13 = vld [vmem:[#allocation7 + $0x88] sm:$0xff]   ;;  %v1833_v14 = vld [vmem:[#allocation7 + $0x50] sm:$0xff]  }
  0x82   :  { %914 = vmatprep.subr.bf16.mxu0 %v1747_v15  ;;  %996 = vmatprep.subr.bf16.mxu1 %v1750_v16  ;;  %v1834_v15 = vld [vmem:[#allocation7 + $0xd0] sm:$0xff]  }
  0x83   :  { %v1835_v16 = vld [vmem:[#allocation7 + $0x10] sm:$0xff]  }
  0x85   :  { %915 = vmatpush1.bf16.msra.mxu0 %v1745_v17  ;;  %997 = vmatpush1.bf16.msra.mxu1 %v1748_v18  ;;  %v1836_v17 = vld [vmem:[#allocation7 + $0x90] sm:$0xff]   ;;  %v1837_v18 = vld [vmem:[#allocation7 + $0x58] sm:$0xff]  }
  0x86   :  { %916 = vmatprep.subr.bf16.mxu0 %v1753_v19  ;;  %998 = vmatprep.subr.bf16.mxu1 %v1756_v20  ;;  %v1838_v19 = vld [vmem:[#allocation7 + $0xd8] sm:$0xff]  }
  0x87   :  { %v1839_v20 = vld [vmem:[#allocation7 + $0x18] sm:$0xff]  }
  0x89   :  { %917 = vmatpush1.bf16.msra.mxu0 %v1751_v21  ;;  %999 = vmatpush1.bf16.msra.mxu1 %v1754_v22  ;;  %v1840_v21 = vld [vmem:[#allocation7 + $0x98] sm:$0xff]   ;;  %v1841_v22 = vld [vmem:[#allocation7 + $0x60] sm:$0xff]  }
  0x8a   :  { %918 = vmatprep.subr.bf16.mxu0 %v1759_v23  ;;  %1000 = vmatprep.subr.bf16.mxu1 %v1762_v24  ;;  %v1842_v23 = vld [vmem:[#allocation7 + $0xe0] sm:$0xff]  }
  0x8b   :  { %v1843_v24 = vld [vmem:[#allocation7 + $0x20] sm:$0xff]  }
  0x8d   :  { %919 = vmatpush1.bf16.msra.mxu0 %v1757_v25  ;;  %1001 = vmatpush1.bf16.msra.mxu1 %v1760_v26  ;;  %v1844_v25 = vld [vmem:[#allocation7 + $0xa0] sm:$0xff]   ;;  %v1845_v26 = vld [vmem:[#allocation7 + $0x68] sm:$0xff]  }
  0x8e   :  { %920 = vmatprep.subr.bf16.mxu0 %v1765_v27  ;;  %1002 = vmatprep.subr.bf16.mxu1 %v1768_v28  ;;  %v1846_v27 = vld [vmem:[#allocation7 + $0xe8] sm:$0xff]  }
  0x8f   :  { %v1847_v28 = vld [vmem:[#allocation7 + $0x28] sm:$0xff]  }
  0x91   :  { %921 = vmatpush1.bf16.msra.mxu0 %v1763_v30  ;;  %1003 = vmatpush1.bf16.msra.mxu1 %v1766_v32  ;;  %v1849_v30 = vld [vmem:[#allocation7 + $0x70] sm:$0xff]  }
  0x92   :  { %922 = vmatprep.subr.bf16.mxu0 %v1771_v33  ;;  %1004 = vmatprep.subr.bf16.mxu1 %v1774_v34  ;;  %v1851_v32 = vld [vmem:[#allocation7 + $0x30] sm:$0xff]   ;;  %v1853_v34 = vld [vmem:[#allocation7 + $0x78] sm:$0xff]  }
  0x93   :  { %v1852_v33 = vld [vmem:[#allocation7 + $0xb0] sm:$0xff]  }
  0x95   :  { %923 = vmatpush1.bf16.msra.mxu0 %v1769_v35  ;;  %1005 = vmatpush1.bf16.msra.mxu1 %v1772_v36  ;;  %v1854_v35 = vld [vmem:[#allocation7 + $0xf8] sm:$0xff]  }
  0x96   :  { %924 = vmatprep.subr.bf16.mxu0 %v1777_v37  ;;  %1006 = vmatprep.subr.bf16.mxu1 %v1780_v38  ;;  %v1855_v36 = vld [vmem:[#allocation7 + $0x38] sm:$0xff]   ;;  %v193_v38 = vlaneseq }
  0x97   :  { %v1856_v37 = vld [vmem:[#allocation7 + $0xb8] sm:$0xff]  }
  0x99   :  { %925 = vmatpush1.bf16.msra.mxu0 %v1775_v39  ;;  %1007 = vmatpush1.bf16.msra.mxu1 %v1778_v40  ;;  %v194_v39 = vshrl.u32 %v193_v38, 7 }
  0x9a   :  { %926 = vmatprep.subr.bf16.mxu0 %v1783_v41  ;;  %1008 = vmatprep.subr.bf16.mxu1 %v1786_v42  ;;  %v191_v42 = vld [vmem:[%s2051_s2] sm:$0xf] }
  0x9b   :  { %v195_v40 = vsub.s32 0, %v194_v39  ;;  %v203_v41 = vsub.s32 2, %v194_v39 }
  0x9d   :  { %927 = vmatpush1.bf16.msra.mxu0 %v1781_v43  ;;  %1009 = vmatpush1.bf16.msra.mxu1 %v1784_v44  ;;  %v199_v43 = vsub.s32 1, %v194_v39  ;;  %v207_v44 = vsub.s32 3, %v194_v39 }
  0x9e   :  { %928 = vmatprep.subr.bf16.mxu0 %v1789_v45  ;;  %1010 = vmatprep.subr.bf16.mxu1 %v1792_v46  ;;  %v196_v45 = vrot.slane %v191_v42, %v195_v40  ;;  %v204_v46 = vrot.slane %v191_v42, %v203_v41 }
  0xa1   :  { %929 = vmatpush1.bf16.msra.mxu0 %v1787_v47  ;;  %1011 = vmatpush1.bf16.msra.mxu1 %v1790_v48  ;;  %v200_v47 = vrot.slane %v191_v42, %v199_v43  ;;  %v208_v48 = vrot.slane %v191_v42, %v207_v44 }
  0xa2   :  { %930 = vmatprep.subr.bf16.mxu0 %v1795_v49  ;;  %1012 = vmatprep.subr.bf16.mxu1 %v1798_v50 }
  0xa5   :  { %931 = vmatpush1.bf16.msra.mxu0 %v1793_v51  ;;  %1013 = vmatpush1.bf16.msra.mxu1 %v1796_v52 }
  0xa6   :  { %932 = vmatprep.subr.bf16.mxu0 %v1801_v53  ;;  %1014 = vmatprep.subr.bf16.mxu1 %v1804_v54 }
  0xa9   :  { %933 = vmatpush1.bf16.msra.mxu0 %v1799_v55  ;;  %1015 = vmatpush1.bf16.msra.mxu1 %v1802_v56 }
  0xaa   :  { %934 = vmatprep.subr.bf16.mxu0 %v1807_v57  ;;  %1016 = vmatprep.subr.bf16.mxu1 %v1810_v58 }
  0xad   :  { %935 = vmatpush1.bf16.msra.mxu0 %v1805_v59  ;;  %1017 = vmatpush1.bf16.msra.mxu1 %v1808_v60 }
  0xae   :  { %936 = vmatprep.subr.bf16.mxu0 %v1813_v61  ;;  %1018 = vmatprep.subr.bf16.mxu1 %v1816_v62 }
  0xb1   :  { %937 = vmatpush1.bf16.msra.mxu0 %v1811_v63  ;;  %1019 = vmatpush1.bf16.msra.mxu1 %v1814_v0 }
  0xb2   :  { %938 = vmatprep.subr.bf16.mxu0 %v1819_v1  ;;  %1020 = vmatprep.subr.bf16.mxu1 %v1822_v2 }
  0xb5   :  { %939 = vmatpush1.bf16.msra.mxu0 %v1817_v3  ;;  %1021 = vmatpush1.bf16.msra.mxu1 %v1820_v4 }
  0xb6   :  { %1565 = vmatprep.subr.bf16.mxu0 %v1825_v5  ;;  %1587 = vmatprep.subr.bf16.mxu1 %v1826_v6 }
  0xb8   :  { %941 = vmatmul.mubr.bf16.vlgmr.msra.gmra.mrb[0].mxu0 %v1402_v7  ;;  %1023 = vmatmul.mubr.bf16.vlgmr.msra.gmra.mrb[0].mxu1 %v1402_v7  ;;  %v1532_v7 = vld [vmem:[%s2053_s4] ss:$0 sm:$0xff] }
  0xb9   :  { %1566 = vmatpush3.bf16.msra.mxu0 %v1827_v8  ;;  %1588 = vmatpush3.bf16.msra.mxu1 %v1828_v9 }
  0xba   :  { %1567 = vmatprep.subr.bf16.mxu0 %v1829_v10  ;;  %1589 = vmatprep.subr.bf16.mxu1 %v1830_v11 }
  0xbd   :  { %1568 = vmatpush3.bf16.msra.mxu0 %v1831_v12  ;;  %1590 = vmatpush3.bf16.msra.mxu1 %v1832_v13 }
  0xbe   :  { %1569 = vmatprep.subr.bf16.mxu0 %v1833_v14  ;;  %1591 = vmatprep.subr.bf16.mxu1 %v1834_v15 }
  0xc1   :  { %1570 = vmatpush3.bf16.msra.mxu0 %v1835_v16  ;;  %1592 = vmatpush3.bf16.msra.mxu1 %v1836_v17 }
  0xc2   :  { %1571 = vmatprep.subr.bf16.mxu0 %v1837_v18  ;;  %1593 = vmatprep.subr.bf16.mxu1 %v1838_v19 }
  0xc5   :  { %1572 = vmatpush3.bf16.msra.mxu0 %v1839_v20  ;;  %1594 = vmatpush3.bf16.msra.mxu1 %v1840_v21 }
  0xc6   :  { %1573 = vmatprep.subr.bf16.mxu0 %v1841_v22  ;;  %1595 = vmatprep.subr.bf16.mxu1 %v1842_v23 }
  0xc9   :  { %1574 = vmatpush3.bf16.msra.mxu0 %v1843_v24  ;;  %1596 = vmatpush3.bf16.msra.mxu1 %v1844_v25 }
  0xca   :  { %1575 = vmatprep.subr.bf16.mxu0 %v1845_v26  ;;  %1597 = vmatprep.subr.bf16.mxu1 %v1846_v27 }
  0xcd   :  { %1576 = vmatpush3.bf16.msra.mxu0 %v1847_v28  ;;  %1598 = vmatpush3.bf16.msra.mxu1 %v1848_v29 }
  0xce   :  { %1577 = vmatprep.subr.bf16.mxu0 %v1849_v30  ;;  %1599 = vmatprep.subr.bf16.mxu1 %v1850_v31 }
  0xd1   :  { %1578 = vmatpush3.bf16.msra.mxu0 %v1851_v32  ;;  %1600 = vmatpush3.bf16.msra.mxu1 %v1852_v33 }
  0xd2   :  { %1579 = vmatprep.subr.bf16.mxu0 %v1853_v34  ;;  %1601 = vmatprep.subr.bf16.mxu1 %v1854_v35 }
  0xd5   :  { %1580 = vmatpush3.bf16.msra.mxu0 %v1855_v36  ;;  %1602 = vmatpush3.bf16.msra.mxu1 %v1856_v37 }
 0x18b   :  { %v942_v49 = vpop.f32.mrb[0].mxu0  ;;  %v1024_v50 = vpop.f32.mrb[0].mxu1 }
 0x18c   :  { %v1609_v51 = vadd.f32 %v942_v49, %v196_v45  ;;  %v1611_v52 = vadd.f32 %v1024_v50, %v204_v46  ;;  %v944_v53 = vpop.f32.mrb[1].mxu0  ;;  %v1026_v54 = vpop.f32.mrb[1].mxu1 }
 0x18d   :  { %v1610_v55 = vadd.f32 %v944_v53, %v200_v47  ;;  %v1612_v56 = vadd.f32 %v1026_v54, %v208_v48  ;;  %v946_v57 = vpop.f32.mrb[2].mxu0  ;;  %v1028_v58 = vpop.f32.mrb[2].mxu1 }
 0x18e   :  { %v1031_v59 = vmax.f32 %v1609_v51, 0.0  ;;  %v1033_v60 = vmax.f32 %v1611_v52, 0.0  ;;  %v947_v61 = vpop.f32.mrb[3].mxu0  ;;  %v1029_v62 = vpop.f32.mrb[3].mxu1 }
 0x18f   :  { %v1032_v63 = vmax.f32 %v1610_v55, 0.0  ;;  %v1034_v0 = vmax.f32 %v1612_v56, 0.0 }
 0x190   :  { %v1035_v3 = vpack.c.bf16 %v1031_v59, %v1031_v59  ;;  %v1037_v4 = vpack.c.bf16 %v1033_v60, %v1033_v60 }
 0x191   :  { %v1036_v1 = vpack.c.bf16 %v1032_v63, %v1032_v63  ;;  %v1038_v2 = vpack.c.bf16 %v1034_v0, %v1034_v0 }
 0x193   :  { %1334 = vmatprep.mubr.bf16.mxu0 %v1036_v1  ;;  %1374 = vmatprep.mubr.bf16.mxu1 %v1038_v2 }
 0x194   :  { %1335 = vmatmul.mubr.bf16.vlgmr.msra.gmra.mrb[4].mxu0 %v1035_v3  ;;  %1375 = vmatmul.mubr.bf16.vlgmr.msra.gmra.mrb[4].mxu1 %v1037_v4 }
 0x267   :  { %v1581_v5 = vpop.f32.mrb[4].mxu0  ;;  %v1603_v6 = vpop.f32.mrb[4].mxu1 }
 0x268   :  { %v1582_v8 = vpop.f32.mrb[5].mxu0  ;;  %v1604_v9 = vpop.f32.mrb[5].mxu1 }
 0x269   :  { %v1583_v10 = vadd.f32 %v1582_v8, %v1581_v5  ;;  %v1605_v11 = vadd.f32 %v1604_v9, %v1603_v6  ;;  %v1584_v12 = vpop.f32.mrb[6].mxu0  ;;  %v1606_v13 = vpop.f32.mrb[6].mxu1 }
 0x26a   :  { %v1585_v14 = vpop.f32.mrb[7].mxu0  ;;  %v1607_v15 = vpop.f32.mrb[7].mxu1 }
 0x26b   :  { %v1337_v16 = vadd.f32 %v1583_v10, %v1532_v7 }
 0x26d   :  { %v1377_v17 = vadd.f32 %v1605_v11, %v1337_v16 }
 0x26f   :  { %v1382_v18 = vmax.f32 %v1377_v17, 0.0 }
 0x271   :  { %1383 = vst [vmem:[#allocation8] sm:$0xff] %v1382_v18 }
 0x272   :  { %1934 = shalt.err (!%p1931_p0)
}
 0x273   :  { %s1935_s12 = scalar_lea.hbm %s2054_s5, 128 }
 0x274   :  { %p1936_p1 = scmp.ne.s32.totalorder %s2054_s5, %s1935_s12  ;;  %p1939_p2 = scmp.lt.u32.totalorder %s1935_s12, %s2054_s5 }
 0x276   :  { %p1941_p3 = pnand %p1939_p2, %p1936_p1 }
 0x278   :  { %1944 = shalt.err (!%p1941_p3)
}
 0x279   :  { %1393 = dma.vmem_to_hbm [thread:$0]  %s1391_s9, 128, %s2054_s5, [#allocation4]  }
 0x27a   :  { %1949 = dma.done.wait [#allocation4], 128  }
 0x27b   :  { %1950 = vsyncadd [#allocation4], 4294967168 }
 0x27c   :  { %1397 = vsyncpa [#allocation3], 1 }
 0x27d   :  { %1398 = vsyncpa [#allocation6], 1 }
 0x27e   :  { %1399 = vsyncpa [#allocation4], 1 }

</bundles_post_ra>
